<compile_context>
chip_gen: v7x
topology: tpu7x:2x2x1
jax: 0.10.0
libtpu: 0.0.40
codegen_flags: <defaults>
</compile_context>

<pallas_src>
import functools

import jax
import jax.numpy as jnp
from jax import lax
from jax.experimental import pallas as pl
from jax.experimental.pallas import tpu as pltpu


# ---------------------------------------------------------------------------
# helpers
# ---------------------------------------------------------------------------
def _round_up(x, m):
    return ((x + m - 1) // m) * m


def _pick_tile_k(ksz, tile_k):
    """Largest multiple-of-128 divisor of ksz that is <= tile_k (lane-dense tiles)."""
    if ksz % 128 != 0:
        raise ValueError("queue_size must be a multiple of 128 for lane-dense l_neg")
    tk = max(128, min(tile_k, ksz))
    tk -= tk % 128
    while ksz % tk != 0:
        tk -= 128
    return tk


def _vmem_limit_bytes(footprint):
    """Raise the scoped-VMEM limit only when the double-buffered footprint needs it."""
    needed = int(footprint * 1.5) + (2 << 20)
    if needed <= (32 << 20):          # compiler default (v6e/v7x scoped) is enough
        return None
    # v7x physical VMEM is 64 MiB: prefer shrinking tile_k over exceeding it.
    return min(needed, 96 << 20)


# ---------------------------------------------------------------------------
# Kernel 1: fused (q-branch, k-branch) projector: Linear -> ReLU -> Linear + normalize
# ---------------------------------------------------------------------------
def projector_norm_kernel(x_ref, w1_ref, b1_ref, w2_ref, b2_ref, o_ref):
    x = x_ref[...]                                                     # [TM, nin]
    h = jnp.dot(x, w1_ref[...], preferred_element_type=jnp.float32) + b1_ref[...]
    h = jnp.maximum(h, 0.0)                                            # ReLU
    y = jnp.dot(h, w2_ref[...], preferred_element_type=jnp.float32) + b2_ref[...]
    # torch.nn.functional.normalize(y, dim=1): y / max(||y||, 1e-12)  (rsqrt -> EUP slot)
    ss = jnp.sum(y * y, axis=1, keepdims=True)
    o_ref[...] = y * lax.rsqrt(jnp.maximum(ss, jnp.float32(1e-24)))


def projector_normalize_fused(x2, w1s, b1s, w2s, b2s, *, tile_m=256):
    """x2: [2, N, nin] (branch 0 = query, branch 1 = key); weights stacked on axis 0."""
    nb, n, nin = x2.shape
    nhid = w1s.shape[-1]
    nout = w2s.shape[-1]
    tm = min(tile_m, _round_up(n, 8))          # fixed tile; row-wise op tolerates padding
    return pl.pallas_call(
        projector_norm_kernel,
        grid=(nb, pl.cdiv(n, tm)),
        in_specs=[
            pl.BlockSpec((None, tm, nin), lambda s, i: (s, i, 0)),    # row tile
            pl.BlockSpec((None, nin, nhid), lambda s, i: (s, 0, 0)),  # branch weights
            pl.BlockSpec((None, 1, nhid), lambda s, i: (s, 0, 0)),
            pl.BlockSpec((None, nhid, nout), lambda s, i: (s, 0, 0)),
            pl.BlockSpec((None, 1, nout), lambda s, i: (s, 0, 0)),
        ],
        out_specs=pl.BlockSpec((None, tm, nout), lambda s, i: (s, i, 0)),
        out_shape=jax.ShapeDtypeStruct((nb, n, nout), jnp.float32),
        compiler_params=pltpu.CompilerParams(
            dimension_semantics=("parallel", "parallel")),
    )(x2, w1s, b1s, w2s, b2s)


# ---------------------------------------------------------------------------
# Kernel 2: contrastive logits, streaming the (bf16) queue exactly once.
#   grid = (num_k_tiles, nqueue)
#   outputs: l_neg   [B, K]              (lane-dense, K multiple of 128)
#            lg_part [num_kt, nq, B]     (lane-dense; summed over kt + transposed outside)
# ---------------------------------------------------------------------------
def moco_logits_kernel(temperature, queue_size,
                       q_ref, qid_ref, elem_ref, queue_ref, ids_ref,
                       lneg_ref, lgp_ref):
    qid = pl.program_id(1)
    inv_t = jnp.float32(1.0 / temperature)
    inv_kt = jnp.float32(1.0 / (queue_size * temperature))

    q = q_ref[...]                                                     # [B, C]   (bf16)
    slab = queue_ref[...]                                              # [C, TILE_K] (bf16)
    s = jnp.dot(q, slab, preferred_element_type=jnp.float32)           # [B, TILE_K] f32

    # --- l_neg: rows whose q_id matches the streamed queue.  Self-hits are masked
    # BEFORE the 1/T scale, exactly like the reference (mask, concat, logits /= T). ---
    row_match = qid_ref[...] == qid                                    # [B, 1]
    id_hit = ids_ref[pl.ds(qid, 1), :] == elem_ref[...]                # [B, TILE_K]
    masked = jnp.where(id_hit, jnp.float32(-9.0e15), s) * inv_t
    # Sublane-masked store: only matching rows are written — no load/blend of the
    # resident tile and no zero-init (every row is written exactly once over qid).
    pltpu.store(lneg_ref, masked, mask=jnp.broadcast_to(row_match, masked.shape))

    # --- global-mean logits partial, reusing the SAME matmul result.  One lane-dense
    # row of the resident [nq, B] tile per qid step (summed over K tiles outside). ---
    lgp_ref[qid, :] = jnp.sum(s, axis=1) * inv_kt


def moco_logits(q, q_ids_col, elem_ids_col, queue, ids, temperature, *,
                tile_k=2048, queue_buffers=2):
    b, c = q.shape
    nq, c2, ksz = queue.shape
    assert c2 == c
    tk = _pick_tile_k(ksz, tile_k)
    num_kt = ksz // tk

    q = q.astype(queue.dtype)          # bf16 MXU operands, f32 accumulation

    qbytes = jnp.dtype(queue.dtype).itemsize
    footprint = (2 * c * tk * qbytes        # streamed queue slab (double-buffered)
                 + 2 * nq * tk * 4          # ids K tile
                 + 2 * b * tk * 4           # resident l_neg output tile
                 + 2 * nq * b * 4           # resident global-partial tile
                 + b * c * qbytes + 4 * b)  # q + id columns
    vmem_limit = _vmem_limit_bytes(footprint)

    queue_kwargs = {}
    if queue_buffers != 2:             # e.g. pl.Buffered(3) on v5e if DMA is exposed
        queue_kwargs["pipeline_mode"] = pl.Buffered(queue_buffers)
    queue_spec = pl.BlockSpec((None, c, tk), lambda kt, qid: (qid, 0, kt), **queue_kwargs)

    kern = functools.partial(moco_logits_kernel, float(temperature), float(ksz))
    lneg, lg_part = pl.pallas_call(
        kern,
        grid=(num_kt, nq),
        in_specs=[
            pl.BlockSpec((b, c), lambda kt, qid: (0, 0)),            # q resident
            pl.BlockSpec((b, 1), lambda kt, qid: (0, 0)),            # q_ids column
            pl.BlockSpec((b, 1), lambda kt, qid: (0, 0)),            # elem_ids column
            queue_spec,                                              # streamed queue slab
            pl.BlockSpec((nq, tk), lambda kt, qid: (0, kt)),         # stored ids, K tile
        ],
        out_specs=(
            pl.BlockSpec((b, tk), lambda kt, qid: (0, kt)),          # lane-dense l_neg
            pl.BlockSpec((None, nq, b), lambda kt, qid: (kt, 0, 0)), # lane-dense partial
        ),
        out_shape=(
            jax.ShapeDtypeStruct((b, ksz), jnp.float32),
            jax.ShapeDtypeStruct((num_kt, nq, b), jnp.float32),
        ),
        compiler_params=pltpu.CompilerParams(
            dimension_semantics=("parallel", "arbitrary"),
            vmem_limit_bytes=vmem_limit),
    )(q, q_ids_col, elem_ids_col, queue, ids)
    return lneg, jnp.sum(lg_part, axis=0).T          # [B, nq]


# ---------------------------------------------------------------------------
# Parameter / buffer construction (deterministic, in-script)
# ---------------------------------------------------------------------------
def xavier_normal(key, fan_in, fan_out, gain=1.414):
    std = gain * (2.0 / (fan_in + fan_out)) ** 0.5
    # stored as [in, out] so the kernel computes x @ W (== torch x @ W.T with W [out, in])
    return jax.random.normal(key, (fan_in, fan_out), jnp.float32) * std


def make_projector_params(key, nin, nhid, nout):
    k1, k2 = jax.random.split(key)
    return {
        "w1": xavier_normal(k1, nin, nhid),
        "b1": jnp.zeros((1, nhid), jnp.float32),
        "w2": xavier_normal(k2, nhid, nout),
        "b2": jnp.zeros((1, nout), jnp.float32),
    }


class MoCoPallas:
    def __init__(self, key, nemb, nout, queue_size, nqueue, mmt=0.999, temperature=0.07,
                 proj_tile_m=256, logits_tile_k=2048, queue_dtype=jnp.bfloat16,
                 queue_buffers=2):
        self.queue_size = queue_size
        self.nqueue = nqueue
        self.mmt = mmt
        self.temperature = temperature
        self.proj_tile_m = proj_tile_m
        self.logits_tile_k = logits_tile_k
        self.queue_buffers = queue_buffers

        k_mlp, k_queue = jax.random.split(key)
        self.mlp_q = make_projector_params(k_mlp, nemb, nemb, nout)
        # key projector initialized as a copy of the query projector (arrays immutable)
        self.mlp_k = dict(self.mlp_q)

        # MomentumQueue buffers: normalize(dim=1) in f32, store in bf16 (halves the
        # dominant HBM stream of the logits kernel; f32 MXU accumulate in the kernel).
        queue = jax.random.normal(k_queue, (nqueue, nout, queue_size), jnp.float32)
        qnorm = jnp.sqrt(jnp.sum(queue * queue, axis=1, keepdims=True))
        self.queue = (queue / jnp.maximum(qnorm, 1e-12)).astype(queue_dtype)
        self.ids = jnp.full((nqueue, queue_size), -1, jnp.int32)
        self.queue_ptr = jnp.zeros((nqueue,), jnp.int32)

    def _momentum_update_key_projector(self):
        m = self.mmt
        self.mlp_k = {name: self.mlp_k[name] * m + self.mlp_q[name] * (1.0 - m)
                      for name in self.mlp_q}
        # TODO(synk): the GAT encoders would also be momentum-updated here (not provided).

    def _dequeue_and_enqueue(self, k, elem_ids, q_ids):
        """Vectorized, host-sync-free equivalent of the sequential per-row enqueue."""
        b = q_ids.shape[0]
        # offset_i = #{j < i : q_ids[j] == q_ids[i]} keeps the sequential pointer
        # semantics when several batch rows target the same queue.
        same = q_ids[:, None] == q_ids[None, :]
        idx = jnp.arange(b, dtype=jnp.int32)
        lower = idx[None, :] < idx[:, None]
        offsets = jnp.sum(jnp.logical_and(same, lower), axis=1).astype(jnp.int32)
        pos = (self.queue_ptr[q_ids] + offsets) % self.queue_size

        self.queue = self.queue.at[q_ids, :, pos].set(k.astype(self.queue.dtype))
        self.ids = self.ids.at[q_ids, pos].set(elem_ids)
        counts = jnp.sum(
            q_ids[:, None] == jnp.arange(self.nqueue, dtype=jnp.int32)[None, :],
            axis=0).astype(jnp.int32)
        self.queue_ptr = (self.queue_ptr + counts) % self.queue_size

    def forward(self, emb_q, idx_in_adjsub_q, emb_k, idx_in_adjsub_k, q_ids, elem_ids):
        q_ids = q_ids.astype(jnp.int32)
        elem_ids = elem_ids.astype(jnp.int32)

        # Gather the batch rows BEFORE projecting (exact: projection+normalize are
        # row-wise), shrinking the projector from N nodes to B rows.
        emb_q_sel = emb_q[idx_in_adjsub_q]                             # [B, nemb]
        emb_k_sel = emb_k[idx_in_adjsub_k]                             # [B, nemb]

        # Momentum update first (only affects the key branch), then one fused
        # projector call for both branches.
        self._momentum_update_key_projector()
        x2 = jnp.stack([emb_q_sel, emb_k_sel], axis=0)                 # [2, B, nemb]
        w1s = jnp.stack([self.mlp_q["w1"], self.mlp_k["w1"]])
        b1s = jnp.stack([self.mlp_q["b1"], self.mlp_k["b1"]])
        w2s = jnp.stack([self.mlp_q["w2"], self.mlp_k["w2"]])
        b2s = jnp.stack([self.mlp_q["b2"], self.mlp_k["b2"]])
        qk = projector_normalize_fused(x2, w1s, b1s, w2s, b2s, tile_m=self.proj_tile_m)
        q, k = qk[0], qk[1]                                            # [B, nout] each

        # --- contrastive logits (single streaming pass over the bf16 queue) ---
        q_ids_col = q_ids.reshape(-1, 1)
        elem_col = elem_ids.reshape(-1, 1)
        l_neg_local, logits_global = moco_logits(
            q, q_ids_col, elem_col, self.queue, self.ids, self.temperature,
            tile_k=self.logits_tile_k, queue_buffers=self.queue_buffers)

        # l_pos (O(B*C)) is cheap wrapper plumbing.
        l_pos = jnp.sum(q * k, axis=1, keepdims=True) * (1.0 / self.temperature)
        # TODO(synk): this concat re-writes B*K values; folding l_pos into the loss (or a
        # 128-padded layout with labels at column K) would avoid it, but is kept so the
        # returned logits keep the reference [B, K+1] layout with the positive at col 0.
        logits_local = jnp.concatenate([l_pos, l_neg_local], axis=1)   # [B, K+1]

        labels_local = jnp.zeros((q.shape[0],), jnp.int32)
        labels_global = q_ids

        # --- dequeue_and_enqueue (vectorized scatter, no host syncs) ---
        self._dequeue_and_enqueue(k, elem_ids, q_ids)

        return logits_local, labels_local, logits_global, labels_global


# ---------------------------------------------------------------------------
# Demo
# ---------------------------------------------------------------------------
if __name__ == "__main__":
    key = jax.random.PRNGKey(0)
    nemb, nout = 32, 32
    queue_size, nqueue = 256, 4
    n_nodes, batch = 32, 16

    k_model, k_eq, k_ek, k_iq, k_ik, k_qid = jax.random.split(key, 6)
    model = MoCoPallas(k_model, nemb, nout, queue_size, nqueue,
                       mmt=0.999, temperature=0.07)

    # TODO(synk): GAT encoder not provided — feed encoder-output embeddings directly.
    emb_q = jax.random.normal(k_eq, (n_nodes, nemb), jnp.float32)
    emb_k = jax.random.normal(k_ek, (n_nodes, nemb), jnp.float32)
    idx_q = jax.random.permutation(k_iq, n_nodes)[:batch].astype(jnp.int32)
    idx_k = jax.random.permutation(k_ik, n_nodes)[:batch].astype(jnp.int32)
    q_ids = jax.random.randint(k_qid, (batch,), 0, nqueue, jnp.int32)
    elem_ids = jnp.arange(100, 100 + batch, dtype=jnp.int32)

    logits_local, labels_local, logits_global, labels_global = model.forward(
        emb_q, idx_q, emb_k, idx_k, q_ids, elem_ids)

    jax.block_until_ready((logits_local, labels_local, logits_global, labels_global,
                           model.queue, model.ids, model.queue_ptr))

    assert logits_local.shape == (batch, queue_size + 1)
    assert logits_global.shape == (batch, nqueue)
    assert labels_local.shape == (batch,)
    assert labels_global.shape == (batch,)
    assert bool(jnp.all(jnp.isfinite(logits_local)))
    assert bool(jnp.all(jnp.isfinite(logits_global)))
    print("KERNEL_OK")
</pallas_src>

<mosaic_0001>
module attributes {stable_mosaic.version = 11 : i64} {
  func.func @projector_norm_kernel(%arg0: i32, %arg1: i32, %arg2: memref<1x16x32xf32, #tpu.memory_space<vmem>>, %arg3: memref<1x32x32xf32, #tpu.memory_space<vmem>>, %arg4: memref<1x1x32xf32, #tpu.memory_space<vmem>>, %arg5: memref<1x32x32xf32, #tpu.memory_space<vmem>>, %arg6: memref<1x1x32xf32, #tpu.memory_space<vmem>>, %arg7: memref<1x16x32xf32, #tpu.memory_space<vmem>>) attributes {dimension_semantics = [#tpu.dimension_semantics<parallel>, #tpu.dimension_semantics<parallel>], iteration_bounds = array<i64: 2, 1>, scalar_prefetch = 0 : i64, scratch_operands = 0 : i64, tpu.core_type = #tpu.core_type<tc>, window_params = [{transform_indices = @transform_0, window_bounds = array<i64: 1, 16, 32>}, {transform_indices = @transform_1, window_bounds = array<i64: 1, 32, 32>}, {transform_indices = @transform_2, window_bounds = array<i64: 1, 1, 32>}, {transform_indices = @transform_3, window_bounds = array<i64: 1, 32, 32>}, {transform_indices = @transform_4, window_bounds = array<i64: 1, 1, 32>}, {transform_indices = @transform_5, window_bounds = array<i64: 1, 16, 32>}]} {
    %c0 = arith.constant 0 : index
    %c0_0 = arith.constant 0 : index
    %c0_1 = arith.constant 0 : index
    %0 = vector.load %arg2[%c0, %c0_0, %c0_1] : memref<1x16x32xf32, #tpu.memory_space<vmem>>, vector<1x16x32xf32>
    %1 = vector.shape_cast %0 : vector<1x16x32xf32> to vector<16x32xf32>
    %c0_2 = arith.constant 0 : index
    %c0_3 = arith.constant 0 : index
    %c0_4 = arith.constant 0 : index
    %2 = vector.load %arg3[%c0_2, %c0_3, %c0_4] : memref<1x32x32xf32, #tpu.memory_space<vmem>>, vector<1x32x32xf32>
    %3 = vector.shape_cast %2 : vector<1x32x32xf32> to vector<32x32xf32>
    %cst = arith.constant dense<0.000000e+00> : vector<16x32xf32>
    %4 = tpu.matmul %1, %3, %cst {dimension_numbers = #tpu.dot_dimension_numbers<[1], [0], [0], [1], [0, 0, 1, 1], [], []>} : vector<16x32xf32>, vector<32x32xf32>, vector<16x32xf32> -> vector<16x32xf32>
    %c0_5 = arith.constant 0 : index
    %c0_6 = arith.constant 0 : index
    %c0_7 = arith.constant 0 : index
    %5 = vector.load %arg4[%c0_5, %c0_6, %c0_7] : memref<1x1x32xf32, #tpu.memory_space<vmem>>, vector<1x1x32xf32>
    %6 = vector.shape_cast %5 : vector<1x1x32xf32> to vector<1x32xf32>
    %7 = vector.broadcast %6 : vector<1x32xf32> to vector<16x32xf32>
    %8 = arith.addf %4, %7 : vector<16x32xf32>
    %cst_8 = arith.constant 0.000000e+00 : f32
    %9 = vector.broadcast %cst_8 : f32 to vector<16x32xf32>
    %10 = arith.maximumf %8, %9 : vector<16x32xf32>
    %c0_9 = arith.constant 0 : index
    %c0_10 = arith.constant 0 : index
    %c0_11 = arith.constant 0 : index
    %11 = vector.load %arg5[%c0_9, %c0_10, %c0_11] : memref<1x32x32xf32, #tpu.memory_space<vmem>>, vector<1x32x32xf32>
    %12 = vector.shape_cast %11 : vector<1x32x32xf32> to vector<32x32xf32>
    %cst_12 = arith.constant dense<0.000000e+00> : vector<16x32xf32>
    %13 = tpu.matmul %10, %12, %cst_12 {dimension_numbers = #tpu.dot_dimension_numbers<[1], [0], [0], [1], [0, 0, 1, 1], [], []>} : vector<16x32xf32>, vector<32x32xf32>, vector<16x32xf32> -> vector<16x32xf32>
    %c0_13 = arith.constant 0 : index
    %c0_14 = arith.constant 0 : index
    %c0_15 = arith.constant 0 : index
    %14 = vector.load %arg6[%c0_13, %c0_14, %c0_15] : memref<1x1x32xf32, #tpu.memory_space<vmem>>, vector<1x1x32xf32>
    %15 = vector.shape_cast %14 : vector<1x1x32xf32> to vector<1x32xf32>
    %16 = vector.broadcast %15 : vector<1x32xf32> to vector<16x32xf32>
    %17 = arith.addf %13, %16 : vector<16x32xf32>
    %18 = arith.mulf %17, %17 : vector<16x32xf32>
    %cst_16 = arith.constant dense<0.000000e+00> : vector<16xf32>
    %19 = vector.multi_reduction <add>, %18, %cst_16 [1] : vector<16x32xf32> to vector<16xf32>
    %20 = vector.shape_cast %19 : vector<16xf32> to vector<16x1xf32>
    %cst_17 = arith.constant 1.000000e-24 : f32
    %21 = vector.broadcast %cst_17 : f32 to vector<16x1xf32>
    %22 = arith.maximumf %20, %21 : vector<16x1xf32>
    %23 = math.rsqrt %22 : vector<16x1xf32>
    %24 = vector.broadcast %23 : vector<16x1xf32> to vector<16x32xf32>
    %25 = arith.mulf %17, %24 : vector<16x32xf32>
    %c0_18 = arith.constant 0 : index
    %c0_19 = arith.constant 0 : index
    %c0_20 = arith.constant 0 : index
    %26 = vector.load %arg7[%c0_18, %c0_19, %c0_20] : memref<1x16x32xf32, #tpu.memory_space<vmem>>, vector<1x16x32xf32>
    %27 = vector.shape_cast %26 : vector<1x16x32xf32> to vector<16x32xf32>
    %28 = vector.shape_cast %25 : vector<16x32xf32> to vector<1x16x32xf32>
    tpu.vector_store %arg7[%c0_18, %c0_19, %c0_20], %28 {strides = array<i32>} : memref<1x16x32xf32, #tpu.memory_space<vmem>>, vector<1x16x32xf32>,
    return
  }
  func.func @transform_0(%arg0: i32, %arg1: i32) -> (i32, i32, i32) {
    %c0_i32 = arith.constant 0 : i32
    %c0_i32_0 = arith.constant 0 : i32
    return %arg0, %arg1, %c0_i32 : i32, i32, i32
  }
  func.func @transform_1(%arg0: i32, %arg1: i32) -> (i32, i32, i32) {
    %c0_i32 = arith.constant 0 : i32
    %c0_i32_0 = arith.constant 0 : i32
    %c0_i32_1 = arith.constant 0 : i32
    return %arg0, %c0_i32, %c0_i32_0 : i32, i32, i32
  }
  func.func @transform_2(%arg0: i32, %arg1: i32) -> (i32, i32, i32) {
    %c0_i32 = arith.constant 0 : i32
    %c0_i32_0 = arith.constant 0 : i32
    %c0_i32_1 = arith.constant 0 : i32
    return %arg0, %c0_i32, %c0_i32_0 : i32, i32, i32
  }
  func.func @transform_3(%arg0: i32, %arg1: i32) -> (i32, i32, i32) {
    %c0_i32 = arith.constant 0 : i32
    %c0_i32_0 = arith.constant 0 : i32
    %c0_i32_1 = arith.constant 0 : i32
    return %arg0, %c0_i32, %c0_i32_0 : i32, i32, i32
  }
  func.func @transform_4(%arg0: i32, %arg1: i32) -> (i32, i32, i32) {
    %c0_i32 = arith.constant 0 : i32
    %c0_i32_0 = arith.constant 0 : i32
    %c0_i32_1 = arith.constant 0 : i32
    return %arg0, %c0_i32, %c0_i32_0 : i32, i32, i32
  }
  func.func @transform_5(%arg0: i32, %arg1: i32) -> (i32, i32, i32) {
    %c0_i32 = arith.constant 0 : i32
    %c0_i32_0 = arith.constant 0 : i32
    return %arg0, %arg1, %c0_i32 : i32, i32, i32
  }
}

</mosaic_0001>

<bundles_post_ra>
// kernel: tpu_custom_call.1
= control target key start
LH: loop header
LB: loop body
LE: loop exit
PB: predicated region body
PF: predicated region fallthrough
CT: control target
= control target key end

     0   :  { %s1410_s0 = inlined_call_operand.hbm [shape: f32[2,16,32], index: 0, kind: input, shape index: {}]   ;;  %s1411_s1 = inlined_call_operand.hbm [shape: f32[2,32,32], index: 1, kind: input, shape index: {}]   ;;  %s1412_s2 = inlined_call_operand.vmem [shape: f32[2,1,32], index: 2, kind: input, shape index: {}]   ;;  %s1413_s3 = inlined_call_operand.hbm [shape: f32[2,32,32], index: 3, kind: input, shape index: {}]   ;;  %s1414_s4 = inlined_call_operand.vmem [shape: f32[2,1,32], index: 4, kind: input, shape index: {}]   ;;  %s1415_s5 = inlined_call_operand.hbm [shape: f32[2,16,32], index: 5, kind: output, shape index: {}]  }
   0x1   :  { %1426 = sst [smem:[#allocation17_spill]] %s1411_s1 }
   0x2   :  { %10 = vsyncpa [#allocation3], 0 }
   0x3   :  { %12 = vsyncpa [#allocation3 + $0x1], 0 }
   0x4   :  { %13 = vsyncpa [#allocation6], 0 }
   0x5   :  { %15 = vsyncpa [#allocation6 + $0x1], 0 }
   0x6   :  { %16 = vsyncpa [#allocation4], 0 }
   0x7   :  { %18 = vsyncpa [#allocation4 + $0x1], 0  ;;  %s1116_s18 = smov 0   ;;  %s1118_s19 = smov 0  }
   0x8   :  { %s1120_s20 = smov 0   ;;  %s1122_s21 = smov 0  }
   0x9   :  { %s1124_s22 = smov 0   ;;  %s1126_s23 = smov 0  }
   0xa LB: > { %1427 = sst [smem:[#allocation12_spill]] %s1056_s18  ;;  %s1147_s24 = sadd.s32 4294967295, %s1076_s23   ;;  %s1076_s23 = sphi %s1126_s23, %s24_s23   ;;  %s1072_s22 = sphi %s1124_s22, %s1456_s22   ;;  %s1068_s21 = sphi %s1122_s21, %s1455_s21   ;;  %s1064_s20 = sphi %s1120_s20, %s1451_s20   ;;  %s1060_s19 = sphi %s1118_s19, %s1454_s19   ;;  %s1056_s18 = sphi %s1116_s18, %s1453_s18  }
   0xb   : > { %1428 = sst [smem:[#allocation13_spill]] %s1064_s20  ;;  %s738_s25 = sadd.s32 4294967294, %s1076_s23  }
   0xc   : > { %s36_s26 = sadd.s32 1, %s1072_s22  ;;  %s45_s27 = sadd.s32 1, %s1064_s20 }
   0xd   : > { %p38_p0 = scmp.ge.s32.totalorder %s36_s26, 2  ;;  %p52_p1 = scmp.ne.s32.totalorder %s1064_s20, %s1060_s19 }
   0xe   : > { %p53_p2 = scmp.eq.s32.totalorder %s1076_s23, 0  ;;  %p58_p3 = scmp.ne.s32.totalorder %s1060_s19, %s1056_s18 }
   0xf   : > { %s1458_s26 = smov (%p38_p0, %s36_s26), 0  ;;  %p59_p5 = scmp.eq.s32.totalorder %s1147_s24, 0 }
  0x10   : > { %1429 = sst [smem:[#allocation14_spill]] %s1458_s26  ;;  %p1159_p4 = por %p53_p2, %p52_p1 }
  0x11   : > { %s40_s29 = ssub.s32 %s1072_s22, %s1458_s26  ;;  %p188_p6 = scmp.eq.s32.totalorder %s1147_s24, 1 }
  0x12   : > { %p43_p7 = scmp.eq.s32.totalorder %s40_s29, 0  ;;  %p1167_p8 = por %p59_p5, %p58_p3 }
  0x13   : > { %p1171_p9 = por %p188_p6, %p52_p1  ;;  %p194_p10 = scmp.eq.s32.totalorder %s738_s25, 1 }
  0x14   : > { %s1431_s30 = scalar_select %p1167_p8, 1, 0 }
  0x15   : > { %s1432_s6 = scalar_select %p1171_p9, 1, 0 }
  0x16   : > { %s1176_s7 = scalar_select %p43_p7, %s1064_s20, %s45_s27  }
  0x17   : > { %p1178_p11 = por %p194_p10, %p58_p3  ;;  %p842_p13 = scmp.lt.s32.totalorder %s1076_s23, 2 }
  0x18   : > { %1433 = sst [smem:[#allocation15_spill]] %s1176_s7  ;;  %s1185_s9 = sand.u32 1, %s1064_s20  }
  0x19   : > { %s1434_s8 = scalar_select %p1178_p11, 1, 0 }
  0x1a   : > { %p1189_p0 = pnand %p842_p13, %p1159_p4  ;;  %s237_s11 = sand.u32 1, %s1076_s23  }
  0x1b   : > { %1435 = sst [smem:[#allocation16_spill]] %s1434_s8  ;;  %s1416_s12 = sshll.u32 %s1185_s9, 5 }
  0x1c   : > { %s1417_s13 = sshll.u32 %s1072_s22, 9  ;;  %s241_s14 = scalar_lea.vmem [#allocation5], %s1416_s12 }
  0x1d   : > { %s248_s15 = sshll.u32 %s241_s14, 4  ;;  %s1437_s1 = sld [smem:[#allocation17_spill]]  ;;  %s1205_s15 = int_to_ptr.vmem [resolvable:$true] %s248_s15 }
  0x1e   : > { %s1207_s27 = scalar_lea.sflag [#allocation6], %s237_s11  ;;  %p1213_p2 = pneg %p1189_p0 }
  0x23   : > { %s1203_s25 = scalar_lea.hbm %s1437_s1, %s1417_s13  ;;  %s905_s17 = scalar_lea.hbm %s1437_s1, 1024 }
  0x24   : > { %s900_s28 = scalar_lea.hbm %s1203_s25, 512  ;;  %p906_p5 = scmp.lt.u32.totalorder %s1203_s25, %s1437_s1 }
  0x25   : > { %p901_p1 = scmp.ne.s32.totalorder %s1203_s25, %s900_s28  ;;  %p907_p6 = scmp.lt.u32.totalorder %s905_s17, %s900_s28 }
  0x26   : > { %p909_p10 = scmp.lt.u32.totalorder %s900_s28, %s1203_s25 }
  0x27   : > { %p903_p3 = pnand %p1213_p2, %p901_p1  ;;  %p908_p7 = por %p907_p6, %p906_p5 }
  0x29   : > { %p904_p4 = pneg %p903_p3  ;;  %p910_p13 = por %p909_p10, %p908_p7 }
  0x2b   : > { %p911_p12 = pnand %p910_p13, %p904_p4 }
  0x2d   : > { %914 = shalt.err (!%p911_p12)
}
  0x2e   : > { %s915_s11 = scalar_lea.vmem %s1205_s15, 512  ;;  %s1078_s14 = smov [#allocation5]  }
  0x2f   : > { %p916_p1 = scmp.ne.s32.totalorder %s1205_s15, %s915_s11  ;;  %s920_s16 = sshll.u32 %s1078_s14, 4  ;;  %s921_s16 = int_to_ptr.vmem [resolvable:$false] %s920_s16 }
  0x30   : > { %s922_s12 = scalar_lea.vmem %s921_s16, 1024  ;;  %p923_p9 = scmp.lt.s32.totalorder %s1205_s15, %s921_s16 }
  0x31   : > { %p918_p3 = pnand %p916_p1, %p1213_p2  ;;  %p924_p8 = scmp.lt.s32.totalorder %s922_s12, %s915_s11 }
  0x33   : > { %p919_p11 = pneg %p918_p3  ;;  %p925_p5 = por %p924_p8, %p923_p9 }
  0x35   : > { %p926_p6 = pnand %p925_p5, %p919_p11 }
  0x37   : > { %929 = shalt.err (!%p926_p6)
}
  0x38   : > { %s1424_s13 = smov 128   ;;  %s1080_s28 = smov 8  }
  0x39   : > { %834 = dma.hbm_to_vmem [thread:$0]  (!%p1189_p0), %s1203_s25, 512, %s1205_s15, %s1207_s27, %s1424_s13, %s1424_s13, %s1080_s28  }
  0x3a   : > { %s1439_s17 = sshll.u32 %s1072_s22, 9  ;;  %p750_p8 = scmp.ge.s32.totalorder %s1076_s23, 1 }
  0x3b   : > { %s1245_s16 = scalar_lea.hbm %s1413_s3, %s1439_s17  ;;  %s1440_s12 = sshll.u32 %s1185_s9, 5 }
  0x3c   : > { %s268_s1 = scalar_lea.vmem [#allocation7], %s1440_s12  ;;  %p289_p9 = scmp.lt.s32.totalorder %s1076_s23, 3 }
  0x3d   : > { %s275_s26 = sshll.u32 %s268_s1, 4  ;;  %s741_s20 = sshll.u32 %s1185_s9, 4  ;;  %s1262_s26 = int_to_ptr.vmem [resolvable:$true] %s275_s26 }
  0x3e   : > { %p1251_p11 = pnand %p750_p8, %p289_p9  ;;  %s766_s8 = sshll.u32 %s1072_s22, 8 }
  0x3f   : > { %s1260_s25 = scalar_lea.hbm %s1410_s0, %s766_s8  ;;  %s218_s17 = scalar_lea.vmem [#allocation2], %s741_s20 }
  0x40   : > { %s1441_s7 = scalar_select %p1251_p11, 1, 0 }
  0x41   : > { %s227_s1 = sshll.u32 %s218_s17, 4  ;;  %s215_s11 = scalar_lea.sflag [#allocation3], %s1185_s9  ;;  %s1264_s1 = int_to_ptr.vmem [resolvable:$true] %s227_s1 }
  0x42   : > { %s930_s14 = scalar_lea.hbm %s1260_s25, 256  ;;  %s935_s8 = scalar_lea.hbm %s1410_s0, 512 }
  0x43   : > { %p931_p12 = scmp.ne.s32.totalorder %s1260_s25, %s930_s14  ;;  %p936_p10 = scmp.lt.u32.totalorder %s1260_s25, %s1410_s0 }
  0x44   : > { %p937_p13 = scmp.lt.u32.totalorder %s935_s8, %s930_s14  ;;  %p939_p3 = scmp.lt.u32.totalorder %s930_s14, %s1260_s25 }
  0x45   : > { %p933_p4 = pnand %p931_p12, %p1213_p2 }
  0x46   : > { %p938_p1 = por %p937_p13, %p936_p10 }
  0x47   : > { %p934_p7 = pneg %p933_p4 }
  0x48   : > { %p940_p5 = por %p939_p3, %p938_p1 }
  0x4a   : > { %p941_p6 = pnand %p940_p5, %p934_p7 }
  0x4c   : > { %944 = shalt.err (!%p941_p6)
}
  0x4d   : > { %s945_s20 = scalar_lea.vmem %s1264_s1, 256  ;;  %s1081_s17 = smov [#allocation2]  }
  0x4e   : > { %p946_p8 = scmp.ne.s32.totalorder %s1264_s1, %s945_s20  ;;  %s950_s12 = sshll.u32 %s1081_s17, 4  ;;  %s951_s12 = int_to_ptr.vmem [resolvable:$false] %s950_s12 }
  0x4f   : > { %s952_s13 = scalar_lea.vmem %s951_s12, 512  ;;  %p953_p4 = scmp.lt.s32.totalorder %s1264_s1, %s951_s12 }
  0x50   : > { %p948_p9 = pnand %p946_p8, %p1213_p2  ;;  %p954_p11 = scmp.lt.s32.totalorder %s952_s13, %s945_s20 }
  0x52   : > { %p949_p12 = pneg %p948_p9  ;;  %p955_p10 = por %p954_p11, %p953_p4 }
  0x54   : > { %p956_p13 = pnand %p955_p10, %p949_p12 }
  0x56   : > { %959 = shalt.err (!%p956_p13)
}
  0x57   : > { %s1442_s14 = smov 128   ;;  %s960_s18 = scalar_lea.hbm %s1245_s16, 512 }
  0x58   : > { %831 = dma.hbm_to_vmem [thread:$0]  (!%p1189_p0), %s1260_s25, 256, %s1264_s1, %s215_s11, %s1442_s14, %s1442_s14, %s1080_s28  }
  0x59   : > { %p961_p7 = scmp.ne.s32.totalorder %s1245_s16, %s960_s18  ;;  %s965_s20 = scalar_lea.hbm %s1413_s3, 1024 }
  0x5a   : > { %p966_p3 = scmp.lt.u32.totalorder %s1245_s16, %s1413_s3  ;;  %p967_p5 = scmp.lt.u32.totalorder %s965_s20, %s960_s18 }
  0x5b   : > { %p963_p11 = pnand %p961_p7, %p1213_p2  ;;  %p969_p8 = scmp.lt.u32.totalorder %s960_s18, %s1245_s16 }
  0x5c   : > { %p968_p6 = por %p967_p5, %p966_p3 }
  0x5d   : > { %p964_p1 = pneg %p963_p11 }
  0x5e   : > { %p970_p9 = por %p969_p8, %p968_p6 }
  0x60   : > { %p971_p12 = pnand %p970_p9, %p964_p1 }
  0x62   : > { %974 = shalt.err (!%p971_p12)
}
  0x63   : > { %s975_s9 = scalar_lea.vmem %s1262_s26, 512  ;;  %s1082_s25 = smov [#allocation7]  }
  0x64   : > { %p976_p4 = scmp.ne.s32.totalorder %s1262_s26, %s975_s9  ;;  %s980_s1 = sshll.u32 %s1082_s25, 4  ;;  %s981_s1 = int_to_ptr.vmem [resolvable:$false] %s980_s1 }
  0x65   : > { %s982_s11 = scalar_lea.vmem %s981_s1, 1024  ;;  %p983_p7 = scmp.lt.s32.totalorder %s1262_s26, %s981_s1 }
  0x66   : > { %p978_p10 = pnand %p976_p4, %p1213_p2  ;;  %p984_p11 = scmp.lt.s32.totalorder %s982_s11, %s975_s9 }
  0x68   : > { %p979_p13 = pneg %p978_p10  ;;  %p985_p3 = por %p984_p11, %p983_p7 }
  0x6a   : > { %p986_p5 = pnand %p985_p3, %p979_p13 }
  0x6c   : > { %989 = shalt.err (!%p986_p5)
}
  0x6d   : > { %837 = dma.hbm_to_vmem [thread:$0]  (!%p1189_p0), %s1245_s16, 512, %s1262_s26, %s1207_s27, %s1442_s14, %s1442_s14, %s1080_s28  }
  0x6e   : > { %p1443_p2 = scmp.ne.s32.totalorder %s1441_s7, 0 }
  0x6f   : > { %s1321_s29 = sand.u32 (!%p1443_p2), 1, %s1060_s19   ;;  %p1444_p1 = scmp.ne.s32.totalorder (!%p1443_p2), %s1431_s30, 0 }
  0x70   : > { %293 = sbr.rel (%p1443_p2) target bundleno = 746 (0x2ea), region = 40  ;;  %s751_s13 = sshll.u32 (!%p1443_p2), %s1321_s29, 4 }
  0x71   : > { %s296_s18 = scalar_lea.sflag (!%p1443_p2), [#allocation3], %s1321_s29  ;;  %s299_s10 = scalar_lea.vmem (!%p1443_p2), [#allocation2], %s751_s13 }
  0x77   : > { %1043 = dma.done.wait (%p1444_p1), %s296_s18, 256  }
  0x78   : > { %1045 = vsyncadd (%p1444_p1), %s296_s18, 4294967040  ;;  %s304_s26 = sand.u32 1, %s1147_s24   ;;  %s752_s7 = sshll.u32 %s1321_s29, 5 }
  0x79   : > { %s305_s27 = scalar_lea.sflag [#allocation6], %s304_s26  ;;  %s308_s28 = scalar_lea.vmem [#allocation5], %s752_s7 }
  0x7a   : > { %1047 = dma.done.wait (%p1444_p1), %s305_s27, 1024  }
  0x7b   : > { %1049 = vsyncadd (%p1444_p1), %s305_s27, 4294966272  ;;  %vm381_vm0 = vcmask 261120   ;;  %v370_v0 = vld [vmem:[%s308_s28] sm:$0xff]  ;;  %v371_v1 = vld [vmem:[%s308_s28 + $0x8] sm:$0xff]  ;;  %s317_s16 = scalar_lea.vmem [#allocation7], %s752_s7  ;;  %p361_p0 = scmp.lt.s32.totalorder %s1068_s21, 1 }
  0x7c   : > { %v372_v2 = vld [vmem:[%s308_s28 + $0x10] sm:$0xff]  ;;  %v804_v3 = vpack.c.bf16 %v371_v1, %v370_v0  ;;  %v373_v4 = vld [vmem:[%s308_s28 + $0x18] sm:$0xff]  ;;  %v465_v7 = vld [vmem:[%s317_s16] sm:$0xff]  ;;  %s769_s12 = sshll.u32 %s1068_s21, 8  ;;  %s359_s9 = scalar_lea.vmem [#allocation8], %s751_s13 }
  0x7d   : > { %v368_v5 = vld [vmem:[%s299_s10] sm:$0xff]  ;;  %v808_v6 = vpack.c.bf16 %v373_v4, %v372_v2  ;;  %v466_v8 = vld [vmem:[%s317_s16 + $0x8] sm:$0xff]  ;;  %v468_v12 = vld [vmem:[%s317_s16 + $0x18] sm:$0xff]  ;;  %s362_s24 = scalar_select %p361_p0, %s1068_s21, 1 }
  0x7e   : > { %790 = vmatprep.mubr.msk.f32.mxu0 %vm381_vm0, %v368_v5  ;;  %805 = vmatprep.subr.bf16.mxu0 %v804_v3  ;;  %v812_v9 = vpack.c.bf16 %v466_v8, %v465_v7  ;;  %v369_v10 = vld [vmem:[%s299_s10 + $0x8] sm:$0xff]  ;;  %v467_v11 = vld [vmem:[%s317_s16 + $0x10] sm:$0xff]  ;;  %s589_s25 = sshll.u32 %s359_s9, 4  ;;  %s1358_s18 = scalar_lea.hbm %s1415_s5, %s769_s12  ;;  %s1360_s25 = int_to_ptr.vmem [resolvable:$true] %s589_s25 }
  0x7f   : > { %807 = vmatpush3.bf16.msra.mxu0 %v804_v3  ;;  %v816_v13 = vpack.c.bf16 %v468_v12, %v467_v11  ;;  %s363_s8 = scalar_lea.vmem %s1412_s2, %s362_s24  ;;  %s366_s17 = scalar_lea.vmem %s1414_s4, %s362_s24 }
  0x80   : > { %809 = vmatprep.subr.bf16.mxu0 %v808_v6  ;;  %813 = vmatprep.subr.bf16.mxu1 %v812_v9  ;;  %v755_v14 = vld [vmem:[%s363_s8] ss:$0 sm:$0xff]  ;;  %s574_s21 = scalar_lea.sflag [#allocation4], %s1321_s29  ;;  %s990_s10 = scalar_lea.vmem %s1360_s25, 256 }
  0x81   : > { %815 = vmatpush3.bf16.msra.mxu1 %v812_v9  ;;  %v758_v21 = vld [vmem:[%s366_s17] ss:$0 sm:$0xff]  ;;  %p991_p6 = scmp.ne.s32.totalorder %s1360_s25, %s990_s10  ;;  %p1445_p8 = scmp.ne.s32.totalorder %s1432_s6, 0 }
  0x82   : > { %817 = vmatprep.subr.bf16.mxu1 %v816_v13  ;;  %s1083_s13 = smov [#allocation8]  }
  0x83   : > { %811 = vmatpush3.bf16.msra.mxu0 %v808_v6  ;;  %p992_p9 = pnand %p991_p6, %p1445_p8  ;;  %s994_s26 = sshll.u32 %s1083_s13, 4  ;;  %s995_s26 = int_to_ptr.vmem [resolvable:$false] %s994_s26 }
  0x84   : > { %s996_s7 = scalar_lea.vmem %s995_s26, 512  ;;  %p997_p4 = scmp.lt.s32.totalorder %s1360_s25, %s995_s26 }
  0x85   : > { %819 = vmatpush3.bf16.msra.mxu1 %v816_v13  ;;  %p993_p12 = pneg %p992_p9  ;;  %p998_p10 = scmp.lt.s32.totalorder %s996_s7, %s990_s10 }
  0x86   : > { %791 = vmatmul.mubr.msk.f32.vlgmr.msra.gmra.mrb[0].mxu0 %vm381_vm0, %v369_v10 }
  0x87   : > { %p999_p13 = por %p998_p10, %p997_p4 }
  0x89   : > { %p1000_p7 = pnand %p999_p13, %p993_p12 }
 0x159   : > { %v792_v15 = vpop.f32.mrb[0].mxu0 }
 0x15a   : > { %v460_v16 = vadd.f32 %v792_v15, %v755_v14  ;;  %v454_v17 = vpop.f32.mrb[1].mxu0 }
 0x15b   : > { %v455_v18 = vadd.f32 %v755_v14, %v454_v17 }
 0x15c   : > { %v464_v20 = vmax.f32 %v460_v16, 0.0 }
 0x15d   : > { %v463_v19 = vmax.f32 %v455_v18, 0.0 }
 0x15f   : > { %801 = vmatprep.mubr.msk.f32.mxu1 %vm381_vm0, %v463_v19 }
 0x160   : > { %802 = vmatmul.mubr.msk.f32.vlgmr.msra.gmra.mrb[0].mxu1 %vm381_vm0, %v464_v20 }
 0x233   : > { %v803_v22 = vpop.f32.mrb[0].mxu1 }
 0x234   : > { %v548_v23 = vpop.f32.mrb[1].mxu1  ;;  %v554_v24 = vadd.f32 %v803_v22, %v758_v21 }
 0x235   : > { %v549_v25 = vadd.f32 %v758_v21, %v548_v23 }
 0x236   : > { %v558_v28 = vmul.f32 %v554_v24, %v554_v24 }
 0x237   : > { %v557_v26 = vmul.f32 %v549_v25, %v549_v25 }
 0x238   : > { %v562_v29 = vsel %vm381_vm0, %v558_v28, 0.0 }
 0x239   : > { %v559_v27 = vsel %vm381_vm0, %v557_v26, 0.0 }
 0x23a   : > { %560 = vadd.xlane.f32.xlu0 %v559_v27 }
 0x23e   : > { %563 = vadd.xlane.f32.xlu0 %v562_v29 }
 0x2c7   : > { %v561_v30 = vpop.xlane.xlu0 %560 }
 0x2c8   : > { %v565_v31 = vmax.f32 %v561_v30, 1e-24 }
 0x2ca   : > { %896 = vrsqrt.f32 %v565_v31 }
 0x2cb   : > { %v564_v32 = vpop.xlane.xlu0 %563 }
 0x2cc   : > { %v566_v33 = vmax.f32 %v564_v32, 1e-24 }
 0x2ce   : > { %898 = vrsqrt.f32 %v566_v33 }
 0x2d4   : > { %v897_v34 = vpop.eup %896 }
 0x2d5   : > { %v569_v35 = vmul.f32 %v897_v34, %v549_v25 }
 0x2d7   : > { %571 = vst.msk [vmem:[%s359_s9] sm:$0xff] %vm381_vm0, %v569_v35 }
 0x2d8   : > { %v899_v36 = vpop.eup %898 }
 0x2d9   : > { %v570_v37 = vmul.f32 %v899_v36, %v554_v24 }
 0x2db   : > { %572 = vst.msk [vmem:[%s359_s9 + $0x8] sm:$0xff] %vm381_vm0, %v570_v37 }
 0x2dc   : > { %1003 = shalt.err (!%p1000_p7)
}
 0x2dd   : > { %s1004_s27 = scalar_lea.hbm %s1358_s18, 256  ;;  %s1008_s24 = scalar_lea.hbm %s1415_s5, 512 }
 0x2de   : > { %p1005_p11 = scmp.ne.s32.totalorder %s1358_s18, %s1004_s27  ;;  %p1009_p2 = scmp.lt.u32.totalorder %s1358_s18, %s1415_s5 }
 0x2df   : > { %p1010_p1 = scmp.lt.u32.totalorder %s1008_s24, %s1004_s27  ;;  %p1012_p6 = scmp.lt.u32.totalorder %s1004_s27, %s1358_s18 }
 0x2e0   : > { %p1006_p3 = pnand %p1005_p11, %p1445_p8 }
 0x2e1   : > { %p1011_p0 = por %p1010_p1, %p1009_p2 }
 0x2e2   : > { %p1007_p5 = pneg %p1006_p3 }
 0x2e3   : > { %p1013_p9 = por %p1012_p6, %p1011_p0 }
 0x2e5   : > { %p1014_p12 = pnand %p1013_p9, %p1007_p5 }
 0x2e7   : > { %1017 = shalt.err (!%p1014_p12)
}
 0x2e8   : > { %s1084_s8 = smov 128   ;;  %s1085_s15 = smov 8  }
 0x2e9   : > { %826 = dma.vmem_to_hbm [thread:$0]  (%p1445_p8), %s1360_s25, 256, %s1358_s18, %s574_s21, %s1084_s8, %s1084_s8, %s1085_s15  }
 0x2ea PF: > { %s1446_s20 = sld [smem:[#allocation12_spill]]  ;;  %s1447_s17 = sld [smem:[#allocation16_spill]] }
 0x2eb   : > { %p1449_p10 = scmp.ge.s32.totalorder %s1076_s23, 2 }
 0x2f0   : > { %s604_s12 = sand.u32 1, %s1446_s20   ;;  %p1448_p4 = scmp.ne.s32.totalorder %s1447_s17, 0 }
 0x2f1   : > { %s605_s9 = scalar_lea.sflag [#allocation4], %s604_s12 }
 0x2f2   : > { %p839_p13 = pnand %p1449_p10, %p1448_p4 }
 0x2f4   : > { %1051 = dma.done.wait (!%p839_p13), %s605_s9, 256  }
 0x2f5   : > { %1053 = vsyncadd (!%p839_p13), %s605_s9, 4294967040  ;;  %s24_s23 = sadd.s32 1, %s1076_s23   ;;  %s1450_s1 = sld [smem:[#allocation13_spill]] }
 0x2f6   : > { %p21_p7 = scmp.ge.s32.totalorder %s24_s23, 4   ;;  %s1451_s20 = sld [smem:[#allocation15_spill]] }
 0x2f7   : > { %s1452_s6 = sld [smem:[#allocation14_spill]]  ;;  %s1453_s18 = smov %s1060_s19 }
 0x2f8   : > { %s1455_s21 = smov %s1072_s22  ;;  %23 = sbr.rel (!%p21_p7) target bundleno = 10 (0xa), region = 115 }
 0x2fb   : > { %s1454_s19 = smov %s1450_s1 }
 0x2fd   : > { %s1456_s22 = smov %s1452_s6 }
 0x2ff   :  { %610 = vsyncpa [#allocation3], 1 }
 0x300   :  { %612 = vsyncpa [#allocation3 + $0x1], 1 }
 0x301   :  { %613 = vsyncpa [#allocation6], 1 }
 0x302   :  { %615 = vsyncpa [#allocation6 + $0x1], 1 }
 0x303   :  { %616 = vsyncpa [#allocation4], 1 }
 0x304   :  { %618 = vsyncpa [#allocation4 + $0x1], 1 }

</bundles_post_ra>
